<compile_context>
chip_gen: v7x
topology: tpu7x:2x2x1
jax: 0.10.0
libtpu: 0.0.40
codegen_flags: <defaults>
</compile_context>

<pallas_src>
import functools

import jax
import jax.numpy as jnp
from jax.experimental import pallas as pl
from jax.experimental.pallas import tpu as pltpu


def _cdiv(a, b):
    return (a + b - 1) // b


def _round_up(x, m):
    return _cdiv(x, m) * m


# ---------------------------------------------------------------------------
# Pallas kernel: 1 state-contribution matmul + 4 chained matmuls per tile.
# ---------------------------------------------------------------------------
def _actor_kernel(hp, max_action,
                  state_ref, ws_ref, wa_ref, wo_ref, out_ref, sc_ref):
    w_dt = ws_ref.dtype

    # All state-dependent terms in one MXU push (f32 accumulation):
    #   sc[:, l*Hp:(l+1)*Hp] = state @ W_l,state + b_l   (hidden layers 1..4)
    #   sc[:, 4*Hp:]         = b_out (via the homogeneous 1-lane)
    sc_ref[...] = jnp.dot(state_ref[...].astype(w_dt), ws_ref[...],
                          preferred_element_type=jnp.float32)

    # Layer 1 has no `a` input: it is purely the state contribution.
    a = jnp.maximum(sc_ref[:, 0:hp], 0.0)

    # Layers 2-4: a = relu(a @ W_l,a + (state @ W_l,state + b_l)).
    # `a` stays a value in vregs; no per-layer VMEM round trip, K = Hp (128-
    # aligned) and the sc slices are lane-aligned full-vreg loads.
    for l in range(3):
        z = jnp.dot(a.astype(w_dt), wa_ref[l],
                    preferred_element_type=jnp.float32)
        a = jnp.maximum(z + sc_ref[:, (l + 1) * hp:(l + 2) * hp], 0.0)

    # Output layer; padded output lanes are exactly 0 (zero weights, zero
    # bias, tanh(0) * max_action = 0) and get sliced away in the wrapper.
    z = jnp.dot(a.astype(w_dt), wo_ref[...],
                preferred_element_type=jnp.float32)
    out_ref[...] = (max_action * jnp.tanh(z + sc_ref[:, 4 * hp:])).astype(
        out_ref.dtype)


# ---------------------------------------------------------------------------
# Wrapper: few big batch tiles, resident packed weights, lane-dense output.
# ---------------------------------------------------------------------------
def actor_forward(state, packed, max_action, action_dim, *,
                  block_batch=1024, min_programs=1):
    ws, wa, wo = packed
    B, S = state.shape
    Sp, Wc = ws.shape
    Hp = wa.shape[1]
    P = wo.shape[1]
    assert Wc == 4 * Hp + P

    # Batch tiling: as few grid steps as possible (per-step fixed overhead
    # dominates this tiny MLP).  `min_programs>=2` shards the "parallel" batch
    # axis across both TensorCores on v7x; keep 1 on v5e/v6e.
    n_prog = max(min_programs, _cdiv(B, block_batch))
    TB = _round_up(_cdiv(B, n_prog), 8)
    Bp = TB * n_prog

    # Homogeneous augmentation [state | 1 | 0-pad]; padded batch rows are 0
    # (their 1-lane is 0 too, and their outputs are sliced off anyway).
    state_aug = jnp.concatenate([state, jnp.ones((B, 1), state.dtype)], axis=1)
    state_aug = jnp.pad(state_aug, ((0, Bp - B), (0, Sp - (S + 1))))

    w_itemsize = jnp.dtype(ws.dtype).itemsize
    cost = pl.CostEstimate(
        flops=2 * Bp * (Sp * Wc + 3 * Hp * Hp + Hp * P),
        transcendentals=Bp * P,  # tanh runs over all padded lanes
        bytes_accessed=(state_aug.size * 4 + Bp * P * 4
                        + (ws.size + wa.size + wo.size) * w_itemsize))

    kernel = functools.partial(_actor_kernel, Hp, float(max_action))

    out = pl.pallas_call(
        kernel,
        out_shape=jax.ShapeDtypeStruct((Bp, P), jnp.float32),
        grid_spec=pltpu.PrefetchScalarGridSpec(
            num_scalar_prefetch=0,
            grid=(n_prog,),
            in_specs=[
                pl.BlockSpec((TB, Sp), lambda i: (i, 0)),        # batch-tiled
                pl.BlockSpec((Sp, Wc), lambda i: (0, 0)),        # resident Ws
                pl.BlockSpec((3, Hp, Hp), lambda i: (0, 0, 0)),  # resident Wa
                pl.BlockSpec((Hp, P), lambda i: (0, 0)),         # resident Wo
            ],
            out_specs=pl.BlockSpec((TB, P), lambda i: (i, 0)),
            scratch_shapes=[pltpu.VMEM((TB, Wc), jnp.float32)],  # sc
        ),
        compiler_params=pltpu.CompilerParams(
            dimension_semantics=("parallel",)),
        cost_estimate=cost,
    )(state_aug, ws, wa, wo)

    return out[:B, :action_dim]


# ---------------------------------------------------------------------------
# Parameters: PyTorch-convention (out, in) weights, zero biases (weight_init).
# ---------------------------------------------------------------------------
def _orthogonal(key, out_dim, in_dim):
    """Orthogonal init like nn.init.orthogonal_ on a (out, in) matrix."""
    n = max(out_dim, in_dim)
    a = jax.random.normal(key, (n, n), dtype=jnp.float32)
    q, r = jnp.linalg.qr(a)
    q = q * jnp.sign(jnp.diagonal(r))
    return q[:out_dim, :in_dim]


def make_params(key, state_dim, action_dim, hidden_dim):
    keys = jax.random.split(key, 5)
    in_dim = hidden_dim + state_dim
    w1 = _orthogonal(keys[0], hidden_dim, state_dim)
    w2 = _orthogonal(keys[1], hidden_dim, in_dim)
    w3 = _orthogonal(keys[2], hidden_dim, in_dim)
    w4 = _orthogonal(keys[3], hidden_dim, in_dim)
    w5 = _orthogonal(keys[4], action_dim, hidden_dim)
    zeros = lambda n: jnp.zeros((n,), jnp.float32)
    return (w1, zeros(hidden_dim), w2, zeros(hidden_dim), w3, zeros(hidden_dim),
            w4, zeros(hidden_dim), w5, zeros(action_dim))


def pack_params(params, state_dim, action_dim, hidden_dim,
                dtype=jnp.bfloat16):
    """Pack the 10 parameter tensors into 3 lane-aligned kernel slabs."""
    (w1, b1, w2, b2, w3, b3, w4, b4, w5, b5) = params
    H, S, A = hidden_dim, state_dim, action_dim
    Hp = _round_up(H, 128)           # lane-aligned hidden width
    P = _round_up(A, 128)            # lane-dense output width
    Sp = _round_up(S + 1, 8)         # rows: [state | 1 | pad]
    Wc = 4 * Hp + P

    # Ws_all: state + bias contribution for all 4 hidden layers and the output
    # bias (via the homogeneous 1-row).  Columns beyond H in each Hp block and
    # rows beyond S+1 are zero.
    ws = jnp.zeros((Sp, Wc), jnp.float32)
    ws = ws.at[:S, 0:H].set(w1.T)                 # layer 1: all-state input
    ws = ws.at[S, 0:H].set(b1)
    for idx, (w, b) in enumerate(((w2, b2), (w3, b3), (w4, b4)), start=1):
        ws = ws.at[:S, idx * Hp:idx * Hp + H].set(w[:, H:H + S].T)
        ws = ws.at[S, idx * Hp:idx * Hp + H].set(b)
    ws = ws.at[S, 4 * Hp:4 * Hp + A].set(b5)      # output bias block

    # Wa: the `a`-input halves of layers 2-4.
    wa = jnp.zeros((3, Hp, Hp), jnp.float32)
    for idx, w in enumerate((w2, w3, w4)):
        wa = wa.at[idx, :H, :H].set(w[:, :H].T)

    # Wo: output layer weights (padded lanes zero).
    wo = jnp.zeros((Hp, P), jnp.float32)
    wo = wo.at[:H, :A].set(w5.T)

    return ws.astype(dtype), wa.astype(dtype), wo.astype(dtype)


# ---------------------------------------------------------------------------
# Pure-JAX reference (mirrors the PyTorch forward; operand dtype emulates the
# kernel's MXU input precision, accumulation stays f32).
# ---------------------------------------------------------------------------
def actor_reference(state, params, max_action, dtype=jnp.float32):
    (w1, b1, w2, b2, w3, b3, w4, b4, w5, b5) = params

    def lin(x, w, b):
        y = jnp.dot(x.astype(dtype), w.T.astype(dtype),
                    preferred_element_type=jnp.float32)
        return y + b.astype(dtype).astype(jnp.float32)

    a = jax.nn.relu(lin(state, w1, b1))
    a = jnp.concatenate([a, state], axis=1)
    a = jax.nn.relu(lin(a, w2, b2))
    a = jnp.concatenate([a, state], axis=1)
    a = jax.nn.relu(lin(a, w3, b3))
    a = jnp.concatenate([a, state], axis=1)
    a = jax.nn.relu(lin(a, w4, b4))
    return max_action * jnp.tanh(lin(a, w5, b5))


if __name__ == "__main__":
    batch = 64
    state_dim = 16
    action_dim = 4
    hidden_dim = 32
    max_action = 2.0

    key = jax.random.PRNGKey(0)
    k_state, k_params = jax.random.split(key)

    state = jax.random.normal(k_state, (batch, state_dim), dtype=jnp.float32)
    params = make_params(k_params, state_dim, action_dim, hidden_dim)

    # --- f32 packing: single grid step, exact check vs the reference. ------
    packed_f32 = pack_params(params, state_dim, action_dim, hidden_dim,
                             dtype=jnp.float32)
    out_f32 = actor_forward(state, packed_f32, max_action, action_dim)
    out_f32 = jax.block_until_ready(out_f32)
    ref_f32 = actor_reference(state, params, max_action, dtype=jnp.float32)
    assert out_f32.shape == (batch, action_dim)
    assert jnp.allclose(out_f32, ref_f32, atol=5e-4, rtol=5e-4), \
        "f32 mismatch vs reference"

    # --- bf16 packing (native MXU path), 2-program grid (v7x both-TC demo),
    #     checked against a bf16-operand / f32-accumulate reference. --------
    packed_bf16 = pack_params(params, state_dim, action_dim, hidden_dim,
                              dtype=jnp.bfloat16)
    out_bf16 = actor_forward(state, packed_bf16, max_action, action_dim,
                             min_programs=2)
    out_bf16 = jax.block_until_ready(out_bf16)
    ref_bf16 = actor_reference(state, params, max_action, dtype=jnp.bfloat16)
    assert out_bf16.shape == (batch, action_dim)
    assert jnp.allclose(out_bf16, ref_bf16, atol=2e-3, rtol=2e-3), \
        "bf16 mismatch vs reference"

    print("KERNEL_OK")
</pallas_src>

<mosaic_0001>
module attributes {stable_mosaic.version = 11 : i64} {
  func.func @_actor_kernel(%arg0: i32, %arg1: memref<64x24xf32, #tpu.memory_space<vmem>>, %arg2: memref<24x640xf32, #tpu.memory_space<vmem>>, %arg3: memref<3x128x128xf32, #tpu.memory_space<vmem>>, %arg4: memref<128x128xf32, #tpu.memory_space<vmem>>, %arg5: memref<64x128xf32, #tpu.memory_space<vmem>>, %arg6: memref<64x640xf32, #tpu.memory_space<vmem>>) attributes {dimension_semantics = [#tpu.dimension_semantics<parallel>], iteration_bounds = array<i64: 1>, scalar_prefetch = 0 : i64, scratch_operands = 1 : i64, tpu.core_type = #tpu.core_type<tc>, window_params = [{transform_indices = @transform_0, window_bounds = array<i64: 64, 24>}, {pipeline_mode = #tpu.pipeline_mode<synchronous>, transform_indices = @transform_1, window_bounds = array<i64: 24, 640>}, {pipeline_mode = #tpu.pipeline_mode<synchronous>, transform_indices = @transform_2, window_bounds = array<i64: 3, 128, 128>}, {pipeline_mode = #tpu.pipeline_mode<synchronous>, transform_indices = @transform_3, window_bounds = array<i64: 128, 128>}, {transform_indices = @transform_4, window_bounds = array<i64: 64, 128>}]} {
    %c0 = arith.constant 0 : index
    %c0_0 = arith.constant 0 : index
    %0 = vector.load %arg1[%c0, %c0_0] : memref<64x24xf32, #tpu.memory_space<vmem>>, vector<64x24xf32>
    %c0_1 = arith.constant 0 : index
    %c0_2 = arith.constant 0 : index
    %1 = vector.load %arg2[%c0_1, %c0_2] : memref<24x640xf32, #tpu.memory_space<vmem>>, vector<24x640xf32>
    %cst = arith.constant dense<0.000000e+00> : vector<64x640xf32>
    %2 = tpu.matmul %0, %1, %cst {dimension_numbers = #tpu.dot_dimension_numbers<[1], [0], [0], [1], [0, 0, 1, 1], [], []>} : vector<64x24xf32>, vector<24x640xf32>, vector<64x640xf32> -> vector<64x640xf32>
    %c0_3 = arith.constant 0 : index
    %c0_4 = arith.constant 0 : index
    %3 = vector.load %arg6[%c0_3, %c0_4] : memref<64x640xf32, #tpu.memory_space<vmem>>, vector<64x640xf32>
    tpu.vector_store %arg6[%c0_3, %c0_4], %2 {strides = array<i32>} : memref<64x640xf32, #tpu.memory_space<vmem>>, vector<64x640xf32>,
    %c0_5 = arith.constant 0 : index
    %c0_6 = arith.constant 0 : index
    %4 = vector.load %arg6[%c0_5, %c0_6] : memref<64x640xf32, #tpu.memory_space<vmem>>, vector<64x128xf32>
    %cst_7 = arith.constant 0.000000e+00 : f32
    %5 = vector.broadcast %cst_7 : f32 to vector<64x128xf32>
    %6 = arith.maximumf %4, %5 : vector<64x128xf32>
    %c0_8 = arith.constant 0 : index
    %c0_9 = arith.constant 0 : index
    %c0_10 = arith.constant 0 : index
    %7 = vector.load %arg3[%c0_8, %c0_9, %c0_10] : memref<3x128x128xf32, #tpu.memory_space<vmem>>, vector<1x128x128xf32>
    %8 = vector.shape_cast %7 : vector<1x128x128xf32> to vector<128x128xf32>
    %cst_11 = arith.constant dense<0.000000e+00> : vector<64x128xf32>
    %9 = tpu.matmul %6, %8, %cst_11 {dimension_numbers = #tpu.dot_dimension_numbers<[1], [0], [0], [1], [0, 0, 1, 1], [], []>} : vector<64x128xf32>, vector<128x128xf32>, vector<64x128xf32> -> vector<64x128xf32>
    %c0_12 = arith.constant 0 : index
    %c128 = arith.constant 128 : index
    %10 = vector.load %arg6[%c0_12, %c128] : memref<64x640xf32, #tpu.memory_space<vmem>>, vector<64x128xf32>
    %11 = arith.addf %9, %10 : vector<64x128xf32>
    %cst_13 = arith.constant 0.000000e+00 : f32
    %12 = vector.broadcast %cst_13 : f32 to vector<64x128xf32>
    %13 = arith.maximumf %11, %12 : vector<64x128xf32>
    %c1 = arith.constant 1 : index
    %c0_14 = arith.constant 0 : index
    %c0_15 = arith.constant 0 : index
    %14 = vector.load %arg3[%c1, %c0_14, %c0_15] : memref<3x128x128xf32, #tpu.memory_space<vmem>>, vector<1x128x128xf32>
    %15 = vector.shape_cast %14 : vector<1x128x128xf32> to vector<128x128xf32>
    %cst_16 = arith.constant dense<0.000000e+00> : vector<64x128xf32>
    %16 = tpu.matmul %13, %15, %cst_16 {dimension_numbers = #tpu.dot_dimension_numbers<[1], [0], [0], [1], [0, 0, 1, 1], [], []>} : vector<64x128xf32>, vector<128x128xf32>, vector<64x128xf32> -> vector<64x128xf32>
    %c0_17 = arith.constant 0 : index
    %c256 = arith.constant 256 : index
    %17 = vector.load %arg6[%c0_17, %c256] : memref<64x640xf32, #tpu.memory_space<vmem>>, vector<64x128xf32>
    %18 = arith.addf %16, %17 : vector<64x128xf32>
    %cst_18 = arith.constant 0.000000e+00 : f32
    %19 = vector.broadcast %cst_18 : f32 to vector<64x128xf32>
    %20 = arith.maximumf %18, %19 : vector<64x128xf32>
    %c2 = arith.constant 2 : index
    %c0_19 = arith.constant 0 : index
    %c0_20 = arith.constant 0 : index
    %21 = vector.load %arg3[%c2, %c0_19, %c0_20] : memref<3x128x128xf32, #tpu.memory_space<vmem>>, vector<1x128x128xf32>
    %22 = vector.shape_cast %21 : vector<1x128x128xf32> to vector<128x128xf32>
    %cst_21 = arith.constant dense<0.000000e+00> : vector<64x128xf32>
    %23 = tpu.matmul %20, %22, %cst_21 {dimension_numbers = #tpu.dot_dimension_numbers<[1], [0], [0], [1], [0, 0, 1, 1], [], []>} : vector<64x128xf32>, vector<128x128xf32>, vector<64x128xf32> -> vector<64x128xf32>
    %c0_22 = arith.constant 0 : index
    %c384 = arith.constant 384 : index
    %24 = vector.load %arg6[%c0_22, %c384] : memref<64x640xf32, #tpu.memory_space<vmem>>, vector<64x128xf32>
    %25 = arith.addf %23, %24 : vector<64x128xf32>
    %cst_23 = arith.constant 0.000000e+00 : f32
    %26 = vector.broadcast %cst_23 : f32 to vector<64x128xf32>
    %27 = arith.maximumf %25, %26 : vector<64x128xf32>
    %c0_24 = arith.constant 0 : index
    %c0_25 = arith.constant 0 : index
    %28 = vector.load %arg4[%c0_24, %c0_25] : memref<128x128xf32, #tpu.memory_space<vmem>>, vector<128x128xf32>
    %cst_26 = arith.constant dense<0.000000e+00> : vector<64x128xf32>
    %29 = tpu.matmul %27, %28, %cst_26 {dimension_numbers = #tpu.dot_dimension_numbers<[1], [0], [0], [1], [0, 0, 1, 1], [], []>} : vector<64x128xf32>, vector<128x128xf32>, vector<64x128xf32> -> vector<64x128xf32>
    %c0_27 = arith.constant 0 : index
    %c512 = arith.constant 512 : index
    %30 = vector.load %arg6[%c0_27, %c512] : memref<64x640xf32, #tpu.memory_space<vmem>>, vector<64x128xf32>
    %31 = arith.addf %29, %30 : vector<64x128xf32>
    %32 = math.tanh %31 : vector<64x128xf32>
    %cst_28 = arith.constant 2.000000e+00 : f32
    %33 = vector.broadcast %cst_28 : f32 to vector<64x128xf32>
    %34 = arith.mulf %33, %32 : vector<64x128xf32>
    %c0_29 = arith.constant 0 : index
    %c0_30 = arith.constant 0 : index
    %35 = vector.load %arg5[%c0_29, %c0_30] : memref<64x128xf32, #tpu.memory_space<vmem>>, vector<64x128xf32>
    tpu.vector_store %arg5[%c0_29, %c0_30], %34 {strides = array<i32>} : memref<64x128xf32, #tpu.memory_space<vmem>>, vector<64x128xf32>,
    return
  }
  func.func @transform_0(%arg0: i32) -> (i32, i32) {
    %c0_i32 = arith.constant 0 : i32
    %c0_i32_0 = arith.constant 0 : i32
    return %arg0, %c0_i32 : i32, i32
  }
  func.func @transform_1(%arg0: i32) -> (i32, i32) {
    %c0_i32 = arith.constant 0 : i32
    %c0_i32_0 = arith.constant 0 : i32
    %c0_i32_1 = arith.constant 0 : i32
    return %c0_i32, %c0_i32_0 : i32, i32
  }
  func.func @transform_2(%arg0: i32) -> (i32, i32, i32) {
    %c0_i32 = arith.constant 0 : i32
    %c0_i32_0 = arith.constant 0 : i32
    %c0_i32_1 = arith.constant 0 : i32
    %c0_i32_2 = arith.constant 0 : i32
    return %c0_i32, %c0_i32_0, %c0_i32_1 : i32, i32, i32
  }
  func.func @transform_3(%arg0: i32) -> (i32, i32) {
    %c0_i32 = arith.constant 0 : i32
    %c0_i32_0 = arith.constant 0 : i32
    %c0_i32_1 = arith.constant 0 : i32
    return %c0_i32, %c0_i32_0 : i32, i32
  }
  func.func @transform_4(%arg0: i32) -> (i32, i32) {
    %c0_i32 = arith.constant 0 : i32
    %c0_i32_0 = arith.constant 0 : i32
    return %arg0, %c0_i32 : i32, i32
  }
}

</mosaic_0001>

<bundles_post_ra>
// kernel: tpu_custom_call.1
= control target key start
LH: loop header
LB: loop body
LE: loop exit
PB: predicated region body
PF: predicated region fallthrough
CT: control target
= control target key end

     0   :  { %9 = vsyncpa [#allocation4], 0  ;;  %s1936_s0 = inlined_call_operand.vmem [shape: f32[64,24], index: 0, kind: input, shape index: {}]   ;;  %s1937_s1 = inlined_call_operand.hbm [shape: f32[24,640], index: 1, kind: input, shape index: {}]   ;;  %s1938_s2 = inlined_call_operand.hbm [shape: f32[3,128,128], index: 2, kind: input, shape index: {}]   ;;  %s1939_s3 = inlined_call_operand.hbm [shape: f32[128,128], index: 3, kind: input, shape index: {}]   ;;  %s1940_s4 = inlined_call_operand.hbm [shape: f32[64,128], index: 4, kind: output, shape index: {}]  }
   0x1   :  { %10 = vsyncpa [#allocation7], 0 }
   0x2   :  { %11 = vsyncpa [#allocation5], 0  ;;  %s1674_s15 = smov [#allocation6]   ;;  %s1580_s19 = scalar_lea.hbm %s1938_s2, 6144 }
   0x3   :  { %s31_s16 = sshll.u32 %s1674_s15, 4  ;;  %p1581_p0 = scmp.ne.s32.totalorder %s1938_s2, %s1580_s19  ;;  %s32_s16 = int_to_ptr.vmem [resolvable:$true] %s31_s16 }
   0x4   :  { %p1584_p1 = scmp.lt.u32.totalorder %s1580_s19, %s1938_s2 }
   0x6   :  { %p1586_p2 = pnand %p1584_p1, %p1581_p0 }
   0x8   :  { %1589 = shalt.err (!%p1586_p2)
}
   0x9   :  { %s1590_s24 = scalar_lea.vmem %s32_s16, 6144  ;;  %p1595_p4 = scmp.lt.s32.totalorder %s32_s16, %s32_s16 }
   0xa   :  { %p1591_p3 = scmp.ne.s32.totalorder %s32_s16, %s1590_s24  ;;  %p1596_p5 = scmp.lt.s32.totalorder %s1590_s24, %s1590_s24 }
   0xc   :  { %p1597_p6 = por %p1596_p5, %p1595_p4 }
   0xe   :  { %p1598_p7 = pnand %p1597_p6, %p1591_p3 }
  0x10   :  { %1601 = shalt.err (!%p1598_p7)
}
  0x11   :  { %s1675_s25 = smov 128   ;;  %s1676_s26 = smov 8  }
  0x12   :  { %37 = dma.hbm_to_vmem [thread:$0]  %s1938_s2, 6144, %s32_s16, [#allocation7], %s1675_s25, %s1675_s25, %s1676_s26  }
  0x13   :  { %s1677_s29 = smov [#allocation3]   ;;  %s1602_s7 = scalar_lea.hbm %s1937_s1, 1920 }
  0x14   :  { %s19_s30 = sshll.u32 %s1677_s29, 4  ;;  %p1603_p8 = scmp.ne.s32.totalorder %s1937_s1, %s1602_s7  ;;  %s20_s30 = int_to_ptr.vmem [resolvable:$true] %s19_s30 }
  0x15   :  { %p1606_p9 = scmp.lt.u32.totalorder %s1602_s7, %s1937_s1 }
  0x17   :  { %p1608_p10 = pnand %p1606_p9, %p1603_p8 }
  0x19   :  { %1611 = shalt.err (!%p1608_p10)
}
  0x1a   :  { %s1612_s12 = scalar_lea.vmem %s20_s30, 1920  ;;  %p1617_p12 = scmp.lt.s32.totalorder %s20_s30, %s20_s30 }
  0x1b   :  { %p1613_p11 = scmp.ne.s32.totalorder %s20_s30, %s1612_s12  ;;  %p1618_p13 = scmp.lt.s32.totalorder %s1612_s12, %s1612_s12 }
  0x1d   :  { %p1619_p0 = por %p1618_p13, %p1617_p12 }
  0x1f   :  { %p1620_p1 = pnand %p1619_p0, %p1613_p11 }
  0x21   :  { %1623 = shalt.err (!%p1620_p1)
}
  0x22   :  { %s1678_s2 = smov 640   ;;  %s1679_s13 = smov 40  }
  0x23   :  { %25 = dma.hbm_to_vmem [thread:$0]  %s1937_s1, 1920, %s20_s30, [#allocation4], %s1678_s2, %s1678_s2, %s1679_s13  }
  0x24   :  { %s1680_s16 = smov [#allocation8]   ;;  %s1624_s20 = scalar_lea.hbm %s1939_s3, 2048 }
  0x25   :  { %s43_s17 = sshll.u32 %s1680_s16, 4  ;;  %p1625_p2 = scmp.ne.s32.totalorder %s1939_s3, %s1624_s20  ;;  %s44_s17 = int_to_ptr.vmem [resolvable:$true] %s43_s17 }
  0x26   :  { %p1628_p3 = scmp.lt.u32.totalorder %s1624_s20, %s1939_s3 }
  0x28   :  { %p1630_p4 = pnand %p1628_p3, %p1625_p2 }
  0x2a   :  { %1633 = shalt.err (!%p1630_p4)
}
  0x2b   :  { %s1634_s27 = scalar_lea.vmem %s44_s17, 2048  ;;  %p1639_p6 = scmp.lt.s32.totalorder %s44_s17, %s44_s17 }
  0x2c   :  { %p1635_p5 = scmp.ne.s32.totalorder %s44_s17, %s1634_s27  ;;  %p1640_p7 = scmp.lt.s32.totalorder %s1634_s27, %s1634_s27 }
  0x2e   :  { %p1641_p8 = por %p1640_p7, %p1639_p6 }
  0x30   :  { %p1642_p9 = pnand %p1641_p8, %p1635_p5 }
  0x32   :  { %1645 = shalt.err (!%p1642_p9)
}
  0x33   :  { %49 = dma.hbm_to_vmem [thread:$0]  %s1939_s3, 2048, %s44_s17, [#allocation7], %s1675_s25, %s1675_s25, %s1676_s26  }
  0x34   :  { %1668 = dma.done.wait [#allocation4], 1920  }
  0x35   :  { %1669 = vsyncadd [#allocation4], 4294965376 }
  0x36   :  { %1670 = dma.done.wait [#allocation7], 8192  }
  0x37   :  { %1671 = vsyncadd [#allocation7], 4294959104  ;;  %v1681_v0 = vmov 0.0   ;;  %v68_v1 = vld [vmem:[#allocation3 + $0x8] sm:$0xff]  ;;  %v73_v2 = vld [vmem:[#allocation3 + $0x30] sm:$0xff]  ;;  %vm82_vm0 = vcmask 195584  }
  0x38   :  { %171 = vmatprep.mubr.f32.mxu0 %v1681_v0  ;;  %195 = vmatprep.mubr.f32.mxu1 %v1681_v0  ;;  %v67_v3 = vld [vmem:[#allocation3] sm:$0xff]  ;;  %v1403_v4 = vpack.c.bf16 %v73_v2, %v68_v1  ;;  %v72_v5 = vld [vmem:[#allocation3 + $0x28] sm:$0xff]  ;;  %v78_v7 = vld [vmem:[#allocation3 + $0x58] sm:$0xff] }
  0x39   :  { %v1405_v6 = vpack.c.bf16 %v72_v5, %v67_v3  ;;  %v77_v8 = vld [vmem:[#allocation3 + $0x50] sm:$0xff]  ;;  %v70_v9 = vld [vmem:[#allocation3 + $0x18] sm:$0xff]  ;;  %v75_v10 = vld [vmem:[#allocation3 + $0x40] sm:$0xff] }
  0x3a   :  { %1404 = vmatprep.subr.bf16.mxu0 %v1403_v4  ;;  %1543 = vmatprep.subr.bf16.mxu1 %v1403_v4  ;;  %v69_v11 = vld [vmem:[#allocation3 + $0x10] sm:$0xff]  ;;  %v74_v12 = vld [vmem:[#allocation3 + $0x38] sm:$0xff]  ;;  %v59_v13 = vld [vmem:[%s1936_s0] sm:$0xff]  ;;  %v1407_v15 = vpack.c.bf16 %v75_v10, %v70_v9 }
  0x3b   :  { %1406 = vmatpush1.bf16.msra.mxu0 %v1405_v6  ;;  %1545 = vmatpush1.bf16.msra.mxu1 %v1405_v6  ;;  %v1758_v14 = vld [vmem:[%s1936_s0 + $0x20] sm:$0xff]  ;;  %v1409_v16 = vpack.c.bf16 %v74_v12, %v69_v11  ;;  %v1767_v17 = vld [vmem:[%s1936_s0 + $0x8] sm:$0xff]  ;;  %v494_v20 = vld [vmem:[#allocation6] sm:$0xff] }
  0x3c   :  { %111 = vmatprep.subr.mxu0 %v78_v7  ;;  %1544 = vmatprep.subr.mxu1 %v78_v7  ;;  %v1773_v18 = vld [vmem:[%s1936_s0 + $0x28] sm:$0xff]  ;;  %v495_v21 = vld [vmem:[#allocation6 + $0x8] sm:$0xff]  ;;  %v1783_v23 = vld [vmem:[%s1936_s0 + $0x10] sm:$0xff] }
  0x3d   :  { %v80_v19 = vld [vmem:[#allocation3 + $0x68] sm:$0xff]  ;;  %v79_v22 = vld [vmem:[#allocation3 + $0x60] sm:$0xff]  ;;  %v1789_v24 = vld [vmem:[%s1936_s0 + $0x30] sm:$0xff]  ;;  %v1415_v25 = vpack.c.bf16 %v495_v21, %v494_v20 }
  0x3e   :  { %v1799_v26 = vld [vmem:[%s1936_s0 + $0x18] sm:$0xff]  ;;  %v496_v28 = vld [vmem:[#allocation6 + $0x10] sm:$0xff]  ;;  %v497_v29 = vld [vmem:[#allocation6 + $0x18] sm:$0xff] }
  0x3f   :  { %112 = vmatpush1.msra.mxu0 %v77_v8  ;;  %1546 = vmatpush1.msra.mxu1 %v77_v8  ;;  %v1805_v27 = vld [vmem:[%s1936_s0 + $0x38] sm:$0xff]  ;;  %v1419_v30 = vpack.c.bf16 %v497_v29, %v496_v28  ;;  %v499_v32 = vld [vmem:[#allocation6 + $0x28] sm:$0xff]  ;;  %v500_v34 = vld [vmem:[#allocation6 + $0x30] sm:$0xff]  ;;  %s1682_s0 = smov [#allocation9]  }
  0x40   :  { %1078 = vmatmul.mubr.msk.f32.vlgmr.msra.gmra.mrb[0].mxu0 %vm82_vm0, %v59_v13  ;;  %1082 = vmatmul.mubr.msk.f32.vlgmr.msra.gmra.mrb[0].mxu1 %vm82_vm0, %v1758_v14  ;;  %v498_v31 = vld [vmem:[#allocation6 + $0x20] sm:$0xff]  ;;  %v501_v35 = vld [vmem:[#allocation6 + $0x38] sm:$0xff]  ;;  %v503_v38 = vld [vmem:[#allocation6 + $0x48] sm:$0xff]  ;;  %s1065_s17 = sshll.u32 %s1682_s0, 4  ;;  %s1066_s17 = int_to_ptr.vmem [resolvable:$true] %s1065_s17 }
  0x41   :  { %177 = vmatprep.mubr.f32.mxu0 %v1681_v0  ;;  %201 = vmatprep.mubr.f32.mxu1 %v1681_v0  ;;  %v1423_v33 = vpack.c.bf16 %v499_v32, %v498_v31  ;;  %v1427_v36 = vpack.c.bf16 %v501_v35, %v500_v34  ;;  %v502_v37 = vld [vmem:[#allocation6 + $0x40] sm:$0xff]  ;;  %v504_v40 = vld [vmem:[#allocation6 + $0x50] sm:$0xff]  ;;  %v505_v41 = vld [vmem:[#allocation6 + $0x58] sm:$0xff]  ;;  %s1646_s18 = scalar_lea.vmem %s1066_s17, 1024  ;;  %p1651_p11 = scmp.lt.s32.totalorder %s1066_s17, %s1066_s17 }
  0x42   :  { %1408 = vmatprep.subr.bf16.mxu1 %v1407_v15  ;;  %v1431_v39 = vpack.c.bf16 %v503_v38, %v502_v37  ;;  %v1435_v42 = vpack.c.bf16 %v505_v41, %v504_v40  ;;  %v506_v43 = vld [vmem:[#allocation6 + $0x60] sm:$0xff]  ;;  %v507_v44 = vld [vmem:[#allocation6 + $0x68] sm:$0xff]  ;;  %v508_v46 = vld [vmem:[#allocation6 + $0x70] sm:$0xff]  ;;  %p1647_p10 = scmp.ne.s32.totalorder %s1066_s17, %s1646_s18  ;;  %p1652_p12 = scmp.lt.s32.totalorder %s1646_s18, %s1646_s18 }
  0x43   :  { %1410 = vmatpush1.bf16.msra.mxu1 %v1409_v16  ;;  %v1439_v45 = vpack.c.bf16 %v507_v44, %v506_v43  ;;  %v509_v47 = vld [vmem:[#allocation6 + $0x78] sm:$0xff]  ;;  %v71_v49 = vld [vmem:[#allocation3 + $0x20] sm:$0xff]  ;;  %v76_v50 = vld [vmem:[#allocation3 + $0x48] sm:$0xff] }
  0x44   :  { %1079 = vmatmul.mubr.msk.f32.gmra.mrb[2].mxu0 %vm82_vm0, %v1767_v17  ;;  %1083 = vmatmul.mubr.msk.f32.gmra.mrb[2].mxu1 %vm82_vm0, %v1773_v18  ;;  %v1443_v48 = vpack.c.bf16 %v509_v47, %v508_v46  ;;  %v1411_v51 = vpack.c.bf16 %v76_v50, %v71_v49  ;;  %v81_v52 = vld [vmem:[#allocation3 + $0x70] sm:$0xff]  ;;  %v632_v53 = vld [vmem:[#allocation6 + $0x80] sm:$0xff]  ;;  %v633_v54 = vld [vmem:[#allocation6 + $0x88] sm:$0xff]  ;;  %p1653_p13 = por %p1652_p12, %p1651_p11 }
  0x45   :  { %183 = vmatprep.mubr.f32.mxu0 %v1681_v0  ;;  %207 = vmatprep.mubr.f32.mxu1 %v1681_v0  ;;  %v634_v55 = vld [vmem:[#allocation6 + $0x90] sm:$0xff]  ;;  %v635_v56 = vld [vmem:[#allocation6 + $0x98] sm:$0xff]  ;;  %v1447_v57 = vpack.c.bf16 %v633_v54, %v632_v53  ;;  %v636_v59 = vld [vmem:[#allocation6 + $0xa0] sm:$0xff] }
  0x46   :  { %224 = vmatprep.subr.mxu1 %v80_v19  ;;  %1412 = vmatprep.subr.bf16.mxu0 %v1411_v51  ;;  %v1451_v58 = vpack.c.bf16 %v635_v56, %v634_v55  ;;  %v637_v60 = vld [vmem:[#allocation6 + $0xa8] sm:$0xff]  ;;  %v638_v62 = vld [vmem:[#allocation6 + $0xb0] sm:$0xff]  ;;  %v639_v63 = vld [vmem:[#allocation6 + $0xb8] sm:$0xff]  ;;  %p1654_p0 = pnand %p1653_p13, %p1647_p10 }
  0x47   :  { %225 = vmatpush1.msra.mxu1 %v79_v22  ;;  %1414 = vmatpush3.bf16.msra.mxu0 %v1411_v51  ;;  %v1455_v61 = vpack.c.bf16 %v637_v60, %v636_v59  ;;  %v640_v1 = vld [vmem:[#allocation6 + $0xc0] sm:$0xff]  ;;  %v641_v2 = vld [vmem:[#allocation6 + $0xc8] sm:$0xff]  ;;  %v642_v4 = vld [vmem:[#allocation6 + $0xd0] sm:$0xff] }
  0x48   :  { %1080 = vmatmul.mubr.msk.f32.gmra.mrb[4].mxu0 %vm82_vm0, %v1783_v23  ;;  %1084 = vmatmul.mubr.msk.f32.gmra.mrb[4].mxu1 %vm82_vm0, %v1789_v24  ;;  %v1463_v3 = vpack.c.bf16 %v641_v2, %v640_v1  ;;  %v643_v5 = vld [vmem:[#allocation6 + $0xd8] sm:$0xff]  ;;  %v644_v7 = vld [vmem:[#allocation6 + $0xe0] sm:$0xff]  ;;  %v645_v8 = vld [vmem:[#allocation6 + $0xe8] sm:$0xff] }
  0x49   :  { %189 = vmatprep.mubr.f32.mxu0 %v1681_v0  ;;  %213 = vmatprep.mubr.f32.mxu1 %v1681_v0  ;;  %v1467_v6 = vpack.c.bf16 %v643_v5, %v642_v4  ;;  %v1471_v9 = vpack.c.bf16 %v645_v8, %v644_v7  ;;  %v646_v50 = vld [vmem:[#allocation6 + $0xf0] sm:$0xff]  ;;  %v647_v51 = vld [vmem:[#allocation6 + $0xf8] sm:$0xff]  ;;  %v770_v53 = vld [vmem:[#allocation6 + $0x100] sm:$0xff] }
  0x4a   :  { %1416 = vmatprep.subr.bf16.mxu1 %v1415_v25  ;;  %1213 = vmatprep.subr.mxu0 %v81_v52  ;;  %v771_v54 = vld [vmem:[#allocation6 + $0x108] sm:$0xff]  ;;  %v772_v55 = vld [vmem:[#allocation6 + $0x110] sm:$0xff]  ;;  %v774_v59 = vld [vmem:[#allocation6 + $0x120] sm:$0xff] }
  0x4b   :  { %1214 = vmatpush3.msra.mxu0 %v81_v52  ;;  %v1475_v52 = vpack.c.bf16 %v647_v51, %v646_v50  ;;  %v1479_v56 = vpack.c.bf16 %v771_v54, %v770_v53  ;;  %v775_v60 = vld [vmem:[#allocation6 + $0x128] sm:$0xff]  ;;  %v778_v1 = vld [vmem:[#allocation6 + $0x140] sm:$0xff]  ;;  %v780_v4 = vld [vmem:[#allocation6 + $0x150] sm:$0xff] }
  0x4c   :  { %1081 = vmatmul.mubr.msk.f32.gmra.mrb[6].mxu0 %vm82_vm0, %v1799_v26  ;;  %1085 = vmatmul.mubr.msk.f32.gmra.mrb[6].mxu1 %vm82_vm0, %v1805_v27  ;;  %v779_v2 = vld [vmem:[#allocation6 + $0x148] sm:$0xff]  ;;  %v781_v5 = vld [vmem:[#allocation6 + $0x158] sm:$0xff]  ;;  %v782_v7 = vld [vmem:[#allocation6 + $0x160] sm:$0xff] }
  0x4d   :  { %284 = vmatprep.mubr.f32.mxu1 %v1681_v0  ;;  %1215 = vmatprep.mubr.msk.f32.mxu0 %vm82_vm0, %v59_v13  ;;  %v783_v8 = vld [vmem:[#allocation6 + $0x168] sm:$0xff]  ;;  %v785_v54 = vld [vmem:[#allocation6 + $0x178] sm:$0xff] }
  0x4e   :  { %1448 = vmatprep.subr.bf16.mxu0 %v1447_v57 }
  0x50   :  { %1086 = vmatmul.mubr.msk.f32.vlgmr.msra.gmra.mrb[8].mxu1 %vm82_vm0, %v59_v13  ;;  %1216 = vmatmul.mubr.msk.f32.vlgmr.msra.gmra.mrb[8].mxu0 %vm82_vm0, %v1767_v17 }
  0x51   :  { %1418 = vmatpush3.bf16.msra.mxu1 %v1415_v25  ;;  %290 = vmatprep.mubr.f32.mxu1 %v1681_v0 }
  0x52   :  { %1420 = vmatprep.subr.bf16.mxu1 %v1419_v30  ;;  %1450 = vmatpush3.bf16.msra.mxu0 %v1447_v57  ;;  %v773_v57 = vld [vmem:[#allocation6 + $0x118] sm:$0xff] }
  0x53   :  { %1218 = vmatprep.mubr.msk.f32.mxu0 %vm82_vm0, %v1783_v23  ;;  %1452 = vmatprep.subr.bf16.mxu0 %v1451_v58 }
  0x54   :  { %1087 = vmatmul.mubr.msk.f32.gmra.mrb[10].mxu1 %vm82_vm0, %v1767_v17  ;;  %1219 = vmatmul.mubr.msk.f32.gmra.mrb[10].mxu0 %vm82_vm0, %v1799_v26 }
  0x55   :  { %1422 = vmatpush3.bf16.msra.mxu1 %v1419_v30  ;;  %296 = vmatprep.mubr.f32.mxu1 %v1681_v0 }
  0x56   :  { %1424 = vmatprep.subr.bf16.mxu1 %v1423_v33  ;;  %1454 = vmatpush3.bf16.msra.mxu0 %v1451_v58  ;;  %v1483_v58 = vpack.c.bf16 %v773_v57, %v772_v55  ;;  %v909_v57 = vld [vmem:[#allocation8 + $0x10] sm:$0xff] }
  0x57   :  { %1221 = vmatprep.mubr.msk.f32.mxu0 %vm82_vm0, %v1758_v14  ;;  %1456 = vmatprep.subr.bf16.mxu0 %v1455_v61 }
  0x58   :  { %1088 = vmatmul.mubr.msk.f32.gmra.mrb[12].mxu1 %vm82_vm0, %v1783_v23  ;;  %1222 = vmatmul.mubr.msk.f32.gmra.mrb[12].mxu0 %vm82_vm0, %v1773_v18 }
  0x59   :  { %1426 = vmatpush3.bf16.msra.mxu1 %v1423_v33  ;;  %302 = vmatprep.mubr.f32.mxu1 %v1681_v0 }
  0x5a   :  { %1428 = vmatprep.subr.bf16.mxu1 %v1427_v36  ;;  %1458 = vmatpush3.bf16.msra.mxu0 %v1455_v61  ;;  %v1487_v61 = vpack.c.bf16 %v775_v60, %v774_v59  ;;  %v910_v59 = vld [vmem:[#allocation8 + $0x18] sm:$0xff]  ;;  %v911_v60 = vld [vmem:[#allocation8 + $0x20] sm:$0xff] }
  0x5b   :  { %1224 = vmatprep.mubr.msk.f32.mxu0 %vm82_vm0, %v1789_v24 }
  0x5c   :  { %1089 = vmatmul.mubr.msk.f32.gmra.mrb[14].mxu1 %vm82_vm0, %v1799_v26  ;;  %1225 = vmatmul.mubr.msk.f32.gmra.mrb[14].mxu0 %vm82_vm0, %v1805_v27 }
  0x5d   :  { %1430 = vmatpush3.bf16.msra.mxu1 %v1427_v36  ;;  %308 = vmatprep.mubr.f32.mxu1 %v1681_v0 }
  0x5e   :  { %1432 = vmatprep.subr.bf16.mxu1 %v1431_v39 }
  0x60   :  { %1090 = vmatmul.mubr.msk.f32.gmra.mrb[16].mxu1 %vm82_vm0, %v1758_v14 }
  0x61   :  { %1434 = vmatpush3.bf16.msra.mxu1 %v1431_v39  ;;  %314 = vmatprep.mubr.f32.mxu1 %v1681_v0 }
  0x62   :  { %1436 = vmatprep.subr.bf16.mxu1 %v1435_v42 }
  0x64   :  { %1091 = vmatmul.mubr.msk.f32.gmra.mrb[18].mxu1 %vm82_vm0, %v1773_v18 }
  0x65   :  { %1438 = vmatpush3.bf16.msra.mxu1 %v1435_v42  ;;  %320 = vmatprep.mubr.f32.mxu1 %v1681_v0 }
  0x66   :  { %1440 = vmatprep.subr.bf16.mxu1 %v1439_v45 }
  0x68   :  { %1092 = vmatmul.mubr.msk.f32.gmra.mrb[20].mxu1 %vm82_vm0, %v1789_v24 }
  0x69   :  { %1442 = vmatpush3.bf16.msra.mxu1 %v1439_v45  ;;  %326 = vmatprep.mubr.f32.mxu1 %v1681_v0  ;;  %v1459_v0 = vpack.c.bf16 %v639_v63, %v638_v62  ;;  %v776_v62 = vld [vmem:[#allocation6 + $0x130] sm:$0xff]  ;;  %v777_v63 = vld [vmem:[#allocation6 + $0x138] sm:$0xff] }
  0x6a   :  { %1444 = vmatprep.subr.bf16.mxu1 %v1443_v48 }
  0x6b   :  { %1460 = vmatprep.subr.bf16.mxu0 %v1459_v0 }
  0x6c   :  { %1093 = vmatmul.mubr.msk.f32.gmra.mrb[22].mxu1 %vm82_vm0, %v1805_v27  ;;  %1462 = vmatpush3.bf16.msra.mxu0 %v1459_v0  ;;  %v1491_v0 = vpack.c.bf16 %v777_v63, %v776_v62  ;;  %v913_v62 = vld [vmem:[#allocation8 + $0x30] sm:$0xff]  ;;  %v914_v63 = vld [vmem:[#allocation8 + $0x38] sm:$0xff] }
  0x6d   :  { %1446 = vmatpush3.bf16.msra.mxu1 %v1443_v48  ;;  %1464 = vmatprep.subr.bf16.mxu0 %v1463_v3 }
  0x6e   :  { %1480 = vmatprep.subr.bf16.mxu1 %v1479_v56 }
  0x70   :  { %1466 = vmatpush3.bf16.msra.mxu0 %v1463_v3  ;;  %v1495_v3 = vpack.c.bf16 %v779_v2, %v778_v1  ;;  %v915_v1 = vld [vmem:[#allocation8 + $0x40] sm:$0xff]  ;;  %v916_v2 = vld [vmem:[#allocation8 + $0x48] sm:$0xff] }
  0x71   :  { %1468 = vmatprep.subr.bf16.mxu0 %v1467_v6 }
  0x74   :  { %1470 = vmatpush3.bf16.msra.mxu0 %v1467_v6  ;;  %v1499_v6 = vpack.c.bf16 %v781_v5, %v780_v4  ;;  %v917_v4 = vld [vmem:[#allocation8 + $0x50] sm:$0xff]  ;;  %v918_v5 = vld [vmem:[#allocation8 + $0x58] sm:$0xff] }
  0x75   :  { %1472 = vmatprep.subr.bf16.mxu0 %v1471_v9 }
  0x78   :  { %1474 = vmatpush3.bf16.msra.mxu0 %v1471_v9  ;;  %v1503_v9 = vpack.c.bf16 %v783_v8, %v782_v7  ;;  %v919_v7 = vld [vmem:[#allocation8 + $0x60] sm:$0xff]  ;;  %v920_v8 = vld [vmem:[#allocation8 + $0x68] sm:$0xff] }
  0x79   :  { %1476 = vmatprep.subr.bf16.mxu0 %v1475_v52 }
  0x7c   :  { %1478 = vmatpush3.bf16.msra.mxu0 %v1475_v52 }
 0x113   :  { %v173_v10 = vpop.f32.mrb[0].mxu0  ;;  %v197_v11 = vpop.f32.mrb[0].mxu1 }
 0x114   :  { %v486_v12 = vmax.f32 %v173_v10, 0.0  ;;  %v1849_v13 = vpop.f32.mrb[1].mxu0  ;;  %v1851_v14 = vpop.f32.mrb[1].mxu1  ;;  %v490_v30 = vmax.f32 %v197_v11, 0.0 }
 0x116   :  { %1259 = vmatprep.mubr.f32.mxu1 %v486_v12 }
 0x117   :  { %v179_v15 = vpop.f32.mrb[2].mxu0  ;;  %v203_v16 = vpop.f32.mrb[2].mxu1 }
 0x118   :  { %v487_v17 = vmax.f32 %v179_v15, 0.0  ;;  %v1853_v18 = vpop.f32.mrb[3].mxu0  ;;  %v1855_v19 = vpop.f32.mrb[3].mxu1  ;;  %v491_v33 = vmax.f32 %v203_v16, 0.0 }
 0x11a   :  { %1260 = vmatmul.mubr.f32.vlgmr.msra.gmra.mrb[24].mxu1 %v487_v17 }
 0x11b   :  { %v185_v20 = vpop.f32.mrb[4].mxu0  ;;  %v209_v21 = vpop.f32.mrb[4].mxu1  ;;  %1482 = vmatpush3.bf16.msra.mxu1 %v1479_v56  ;;  %v908_v56 = vld [vmem:[#allocation8 + $0x8] sm:$0xff] }
 0x11c   :  { %v488_v22 = vmax.f32 %v185_v20, 0.0  ;;  %v1857_v23 = vpop.f32.mrb[5].mxu0  ;;  %v1859_v24 = vpop.f32.mrb[5].mxu1  ;;  %v492_v31 = vmax.f32 %v209_v21, 0.0  ;;  %1484 = vmatprep.subr.bf16.mxu1 %v1483_v58 }
 0x11e   :  { %1262 = vmatprep.mubr.f32.mxu1 %v488_v22 }
 0x11f   :  { %v191_v25 = vpop.f32.mrb[6].mxu0  ;;  %v215_v26 = vpop.f32.mrb[6].mxu1  ;;  %1486 = vmatpush3.bf16.msra.mxu1 %v1483_v58 }
 0x120   :  { %v489_v27 = vmax.f32 %v191_v25, 0.0  ;;  %v1861_v28 = vpop.f32.mrb[7].mxu0  ;;  %v1863_v29 = vpop.f32.mrb[7].mxu1  ;;  %v493_v35 = vmax.f32 %v215_v26, 0.0  ;;  %1488 = vmatprep.subr.bf16.mxu1 %v1487_v61 }
 0x122   :  { %1263 = vmatmul.mubr.f32.gmra.mrb[26].mxu1 %v489_v27 }
 0x123   :  { %1265 = vmatprep.mubr.f32.mxu1 %v490_v30  ;;  %v1865_v32 = vpop.f32.mrb[8].mxu1  ;;  %1490 = vmatpush3.bf16.msra.mxu1 %v1487_v61  ;;  %v912_v61 = vld [vmem:[#allocation8 + $0x28] sm:$0xff] }
 0x124   :  { %v1867_v34 = vpop.f32.mrb[9].mxu1  ;;  %1492 = vmatprep.subr.bf16.mxu1 %v1491_v0 }
 0x126   :  { %1266 = vmatmul.mubr.f32.gmra.mrb[28].mxu1 %v491_v33 }
 0x127   :  { %1268 = vmatprep.mubr.f32.mxu1 %v492_v31  ;;  %v1869_v36 = vpop.f32.mrb[10].mxu1  ;;  %1494 = vmatpush3.bf16.msra.mxu1 %v1491_v0  ;;  %v1523_v0 = vpack.c.bf16 %v914_v63, %v913_v62 }
 0x128   :  { %v1871_v37 = vpop.f32.mrb[11].mxu1  ;;  %1496 = vmatprep.subr.bf16.mxu1 %v1495_v3 }
 0x12a   :  { %1269 = vmatmul.mubr.f32.gmra.mrb[30].mxu1 %v493_v35 }
 0x12b   :  { %v1873_v38 = vpop.f32.mrb[12].mxu1  ;;  %1498 = vmatpush3.bf16.msra.mxu1 %v1495_v3  ;;  %v1527_v3 = vpack.c.bf16 %v916_v2, %v915_v1 }
 0x12c   :  { %v1875_v39 = vpop.f32.mrb[13].mxu1  ;;  %1500 = vmatprep.subr.bf16.mxu1 %v1499_v6 }
 0x12f   :  { %v1877_v40 = vpop.f32.mrb[14].mxu1  ;;  %1502 = vmatpush3.bf16.msra.mxu1 %v1499_v6  ;;  %v1531_v6 = vpack.c.bf16 %v918_v5, %v917_v4 }
 0x130   :  { %v1879_v41 = vpop.f32.mrb[15].mxu1  ;;  %1504 = vmatprep.subr.bf16.mxu1 %v1503_v9 }
 0x133   :  { %v1881_v42 = vpop.f32.mrb[16].mxu1  ;;  %1506 = vmatpush3.bf16.msra.mxu1 %v1503_v9  ;;  %v1535_v9 = vpack.c.bf16 %v920_v8, %v919_v7 }
 0x134   :  { %v1883_v43 = vpop.f32.mrb[17].mxu1 }
 0x137   :  { %v1885_v44 = vpop.f32.mrb[18].mxu1 }
 0x138   :  { %v1887_v45 = vpop.f32.mrb[19].mxu1 }
 0x13b   :  { %v1889_v46 = vpop.f32.mrb[20].mxu1 }
 0x13c   :  { %v1891_v47 = vpop.f32.mrb[21].mxu1 }
 0x13f   :  { %v1893_v48 = vpop.f32.mrb[22].mxu1 }
 0x140   :  { %v1895_v49 = vpop.f32.mrb[23].mxu1 }
 0x1ed   :  { %v1261_v10 = vpop.f32.mrb[24].mxu1 }
 0x1ee   :  { %v590_v11 = vadd.f32 %v1261_v10, %v1853_v18  ;;  %v584_v12 = vpop.f32.mrb[25].mxu1 }
 0x1ef   :  { %v585_v15 = vadd.f32 %v584_v12, %v1849_v13 }
 0x1f0   :  { %v624_v17 = vmax.f32 %v590_v11, 0.0 }
 0x1f1   :  { %v623_v16 = vmax.f32 %v585_v15, 0.0 }
 0x1f3   :  { %1303 = vmatprep.mubr.f32.mxu0 %v623_v16 }
 0x1f4   :  { %1304 = vmatmul.mubr.f32.vlgmr.msra.gmra.mrb[16].mxu0 %v624_v17 }
 0x1f5   :  { %v1264_v20 = vpop.f32.mrb[26].mxu1 }
 0x1f6   :  { %v600_v21 = vadd.f32 %v1264_v20, %v1861_v28  ;;  %v594_v22 = vpop.f32.mrb[27].mxu1 }
 0x1f7   :  { %v595_v25 = vadd.f32 %v594_v22, %v1857_v23 }
 0x1f8   :  { %v626_v30 = vmax.f32 %v600_v21, 0.0 }
 0x1f9   :  { %v625_v26 = vmax.f32 %v595_v25, 0.0  ;;  %v1267_v27 = vpop.f32.mrb[28].mxu1 }
 0x1fa   :  { %v610_v31 = vadd.f32 %v1267_v27, %v1855_v19  ;;  %v604_v33 = vpop.f32.mrb[29].mxu1  ;;  %v784_v19 = vld [vmem:[#allocation6 + $0x170] sm:$0xff] }
 0x1fb   :  { %v605_v18 = vadd.f32 %v604_v33, %v1851_v14  ;;  %1306 = vmatprep.mubr.f32.mxu0 %v625_v26  ;;  %v1507_v55 = vpack.c.bf16 %v785_v54, %v784_v19  ;;  %v907_v14 = vld [vmem:[#allocation8] sm:$0xff] }
 0x1fc   :  { %1307 = vmatmul.mubr.f32.gmra.mrb[18].mxu0 %v626_v30  ;;  %v628_v50 = vmax.f32 %v610_v31, 0.0  ;;  %v1511_v58 = vpack.c.bf16 %v908_v56, %v907_v14 }
 0x1fd   :  { %v627_v13 = vmax.f32 %v605_v18, 0.0  ;;  %v1270_v35 = vpop.f32.mrb[30].mxu1  ;;  %1508 = vmatprep.subr.bf16.mxu1 %v1507_v55 }
 0x1fe   :  { %v620_v51 = vadd.f32 %v1270_v35, %v1863_v29  ;;  %v614_v52 = vpop.f32.mrb[31].mxu1  ;;  %1510 = vmatpush3.bf16.msra.mxu1 %v1507_v55  ;;  %v1515_v29 = vpack.c.bf16 %v910_v59, %v909_v57  ;;  %1512 = vmatprep.subr.bf16.mxu0 %v1511_v58 }
 0x1ff   :  { %v615_v28 = vadd.f32 %v614_v52, %v1859_v24  ;;  %1309 = vmatprep.mubr.f32.mxu0 %v627_v13  ;;  %1514 = vmatpush3.bf16.msra.mxu0 %v1511_v58  ;;  %v1519_v24 = vpack.c.bf16 %v912_v61, %v911_v60  ;;  %v922_v52 = vld [vmem:[#allocation8 + $0x78] sm:$0xff] }
 0x200   :  { %1310 = vmatmul.mubr.f32.gmra.mrb[20].mxu0 %v628_v50  ;;  %v630_v53 = vmax.f32 %v620_v51, 0.0  ;;  %1516 = vmatprep.subr.bf16.mxu0 %v1515_v29 }
 0x201   :  { %v629_v23 = vmax.f32 %v615_v28, 0.0 }
 0x203   :  { %1312 = vmatprep.mubr.f32.mxu0 %v629_v23  ;;  %1518 = vmatpush3.bf16.msra.mxu0 %v1515_v29 }
 0x204   :  { %1313 = vmatmul.mubr.f32.gmra.mrb[22].mxu0 %v630_v53  ;;  %1520 = vmatprep.subr.bf16.mxu0 %v1519_v24 }
 0x207   :  { %1522 = vmatpush3.bf16.msra.mxu0 %v1519_v24 }
 0x208   :  { %1524 = vmatprep.subr.bf16.mxu0 %v1523_v0 }
 0x20b   :  { %1526 = vmatpush3.bf16.msra.mxu0 %v1523_v0 }
 0x20c   :  { %1528 = vmatprep.subr.bf16.mxu0 %v1527_v3 }
 0x20f   :  { %1530 = vmatpush3.bf16.msra.mxu0 %v1527_v3 }
 0x210   :  { %1532 = vmatprep.subr.bf16.mxu0 %v1531_v6 }
 0x213   :  { %1534 = vmatpush3.bf16.msra.mxu0 %v1531_v6 }
 0x214   :  { %1536 = vmatprep.subr.bf16.mxu0 %v1535_v9 }
 0x217   :  { %1538 = vmatpush3.bf16.msra.mxu0 %v1535_v9 }
 0x2c7   :  { %v1305_v10 = vpop.f32.mrb[16].mxu0 }
 0x2c8   :  { %v728_v11 = vadd.f32 %v1305_v10, %v1869_v36  ;;  %v722_v12 = vpop.f32.mrb[17].mxu0 }
 0x2c9   :  { %v723_v15 = vadd.f32 %v722_v12, %v1865_v32 }
 0x2ca   :  { %v762_v17 = vmax.f32 %v728_v11, 0.0 }
 0x2cb   :  { %v761_v16 = vmax.f32 %v723_v15, 0.0 }
 0x2cd   :  { %1347 = vmatprep.mubr.f32.mxu1 %v761_v16 }
 0x2ce   :  { %1348 = vmatmul.mubr.f32.vlgmr.msra.gmra.mrb[32].mxu1 %v762_v17 }
 0x2cf   :  { %v1308_v20 = vpop.f32.mrb[18].mxu0 }
 0x2d0   :  { %v738_v21 = vadd.f32 %v1308_v20, %v1877_v40  ;;  %v732_v22 = vpop.f32.mrb[19].mxu0 }
 0x2d1   :  { %v733_v25 = vadd.f32 %v732_v22, %v1873_v38 }
 0x2d2   :  { %v764_v30 = vmax.f32 %v738_v21, 0.0 }
 0x2d3   :  { %v763_v26 = vmax.f32 %v733_v25, 0.0  ;;  %v1311_v27 = vpop.f32.mrb[20].mxu0 }
 0x2d4   :  { %v748_v31 = vadd.f32 %v1311_v27, %v1885_v44  ;;  %v742_v33 = vpop.f32.mrb[21].mxu0  ;;  %v921_v44 = vld [vmem:[#allocation8 + $0x70] sm:$0xff] }
 0x2d5   :  { %v743_v36 = vadd.f32 %v742_v33, %v1881_v42  ;;  %1350 = vmatprep.mubr.f32.mxu1 %v763_v26  ;;  %v1539_v28 = vpack.c.bf16 %v922_v52, %v921_v44 }
 0x2d6   :  { %1351 = vmatmul.mubr.f32.gmra.mrb[34].mxu1 %v764_v30  ;;  %v766_v13 = vmax.f32 %v748_v31, 0.0 }
 0x2d7   :  { %v765_v32 = vmax.f32 %v743_v36, 0.0  ;;  %v1314_v18 = vpop.f32.mrb[22].mxu0  ;;  %1540 = vmatprep.subr.bf16.mxu0 %v1539_v28 }
 0x2d8   :  { %v758_v35 = vadd.f32 %v1314_v18, %v1893_v48  ;;  %v752_v50 = vpop.f32.mrb[23].mxu0  ;;  %1542 = vmatpush3.bf16.msra.mxu0 %v1539_v28 }
 0x2d9   :  { %v753_v40 = vadd.f32 %v752_v50, %v1889_v46  ;;  %1353 = vmatprep.mubr.f32.mxu1 %v765_v32 }
 0x2da   :  { %1354 = vmatmul.mubr.f32.gmra.mrb[36].mxu1 %v766_v13  ;;  %v768_v51 = vmax.f32 %v758_v35, 0.0 }
 0x2db   :  { %v767_v38 = vmax.f32 %v753_v40, 0.0 }
 0x2dd   :  { %1356 = vmatprep.mubr.f32.mxu1 %v767_v38 }
 0x2de   :  { %1357 = vmatmul.mubr.f32.gmra.mrb[38].mxu1 %v768_v51 }
 0x3a1   :  { %v1349_v42 = vpop.f32.mrb[32].mxu1 }
 0x3a2   :  { %v866_v23 = vadd.f32 %v1349_v42, %v1871_v37  ;;  %v860_v53 = vpop.f32.mrb[33].mxu1 }
 0x3a3   :  { %v861_v48 = vadd.f32 %v860_v53, %v1867_v34 }
 0x3a4   :  { %v900_v54 = vmax.f32 %v866_v23, 0.0 }
 0x3a5   :  { %v899_v19 = vmax.f32 %v861_v48, 0.0 }
 0x3a7   :  { %1391 = vmatprep.mubr.f32.mxu0 %v899_v19 }
 0x3a8   :  { %1392 = vmatmul.mubr.f32.vlgmr.msra.gmra.mrb[8].mxu0 %v900_v54 }
 0x3a9   :  { %v1352_v46 = vpop.f32.mrb[34].mxu1 }
 0x3aa   :  { %v876_v55 = vadd.f32 %v1352_v46, %v1879_v41  ;;  %v870_v14 = vpop.f32.mrb[35].mxu1 }
 0x3ab   :  { %v871_v56 = vadd.f32 %v870_v14, %v1875_v39 }
 0x3ac   :  { %v902_v59 = vmax.f32 %v876_v55, 0.0 }
 0x3ad   :  { %v901_v57 = vmax.f32 %v871_v56, 0.0  ;;  %v1355_v58 = vpop.f32.mrb[36].mxu1 }
 0x3ae   :  { %v886_v29 = vadd.f32 %v1355_v58, %v1887_v45  ;;  %v880_v60 = vpop.f32.mrb[37].mxu1 }
 0x3af   :  { %v881_v37 = vadd.f32 %v880_v60, %v1883_v43  ;;  %1394 = vmatprep.mubr.f32.mxu0 %v901_v57 }
 0x3b0   :  { %1395 = vmatmul.mubr.f32.gmra.mrb[10].mxu0 %v902_v59  ;;  %v904_v24 = vmax.f32 %v886_v29, 0.0 }
 0x3b1   :  { %v903_v34 = vmax.f32 %v881_v37, 0.0  ;;  %v1358_v61 = vpop.f32.mrb[38].mxu1 }
 0x3b2   :  { %v896_v62 = vadd.f32 %v1358_v61, %v1895_v49  ;;  %v890_v63 = vpop.f32.mrb[39].mxu1 }
 0x3b3   :  { %v891_v41 = vadd.f32 %v890_v63, %v1891_v47  ;;  %1397 = vmatprep.mubr.f32.mxu0 %v903_v34 }
 0x3b4   :  { %1398 = vmatmul.mubr.f32.gmra.mrb[12].mxu0 %v904_v24  ;;  %v906_v0 = vmax.f32 %v896_v62, 0.0 }
 0x3b5   :  { %v905_v39 = vmax.f32 %v891_v41, 0.0 }
 0x3b7   :  { %1400 = vmatprep.mubr.f32.mxu0 %v905_v39 }
 0x3b8   :  { %1401 = vmatmul.mubr.f32.gmra.mrb[14].mxu0 %v906_v0 }
 0x47b   :  { %v1393_v45 = vpop.f32.mrb[8].mxu0 }
 0x47c   :  { %1564 = vtanh.f32 %v1393_v45  ;;  %v997_v1 = vpop.f32.mrb[9].mxu0 }
 0x47d   :  { %1566 = vtanh.f32 %v997_v1 }
 0x483   :  { %v1396_v43 = vpop.f32.mrb[10].mxu0 }
 0x484   :  { %1568 = vtanh.f32 %v1396_v43  ;;  %v1007_v2 = vpop.f32.mrb[11].mxu0 }
 0x485   :  { %1570 = vtanh.f32 %v1007_v2 }
 0x486   :  { %v1565_v3 = vpop.eup %1564 }
 0x487   :  { %v1567_v4 = vpop.eup %1566  ;;  %v1045_v49 = vmul.f32 2.0, %v1565_v3  ;;  %v1399_v5 = vpop.f32.mrb[12].mxu0 }
 0x488   :  { %v1044_v6 = vmul.f32 2.0, %v1567_v4  ;;  %1572 = vtanh.f32 %v1399_v5  ;;  %v1017_v47 = vpop.f32.mrb[13].mxu0 }
 0x489   :  { %1053 = vst [vmem:[#allocation9 + $0x8] sm:$0xff] %v1045_v49  ;;  %1574 = vtanh.f32 %v1017_v47 }
 0x48a   :  { %1052 = vst [vmem:[#allocation9] sm:$0xff] %v1044_v6 }
 0x48b   :  { %v1402_v7 = vpop.f32.mrb[14].mxu0 }
 0x48c   :  { %1576 = vtanh.f32 %v1402_v7  ;;  %v1027_v8 = vpop.f32.mrb[15].mxu0 }
 0x48d   :  { %1578 = vtanh.f32 %v1027_v8 }
 0x48e   :  { %v1569_v9 = vpop.eup %1568 }
 0x48f   :  { %v1571_v10 = vpop.eup %1570  ;;  %v1047_v11 = vmul.f32 2.0, %v1569_v9 }
 0x490   :  { %v1046_v12 = vmul.f32 2.0, %v1571_v10 }
 0x491   :  { %1055 = vst [vmem:[#allocation9 + $0x18] sm:$0xff] %v1047_v11 }
 0x492   :  { %v1573_v15 = vpop.eup %1572  ;;  %1054 = vst [vmem:[#allocation9 + $0x10] sm:$0xff] %v1046_v12 }
 0x493   :  { %v1575_v16 = vpop.eup %1574  ;;  %v1049_v17 = vmul.f32 2.0, %v1573_v15 }
 0x494   :  { %v1048_v20 = vmul.f32 2.0, %v1575_v16 }
 0x495   :  { %1057 = vst [vmem:[#allocation9 + $0x28] sm:$0xff] %v1049_v17 }
 0x496   :  { %v1577_v21 = vpop.eup %1576  ;;  %1056 = vst [vmem:[#allocation9 + $0x20] sm:$0xff] %v1048_v20 }
 0x497   :  { %v1579_v22 = vpop.eup %1578  ;;  %v1051_v25 = vmul.f32 2.0, %v1577_v21 }
 0x498   :  { %v1050_v26 = vmul.f32 2.0, %v1579_v22 }
 0x499   :  { %1059 = vst [vmem:[#allocation9 + $0x38] sm:$0xff] %v1051_v25 }
 0x49a   :  { %1058 = vst [vmem:[#allocation9 + $0x30] sm:$0xff] %v1050_v26 }
 0x49b   :  { %1657 = shalt.err (!%p1654_p0)
}
 0x49c   :  { %s1658_s21 = scalar_lea.hbm %s1940_s4, 1024 }
 0x49d   :  { %p1659_p1 = scmp.ne.s32.totalorder %s1940_s4, %s1658_s21  ;;  %p1662_p2 = scmp.lt.u32.totalorder %s1658_s21, %s1940_s4 }
 0x49f   :  { %p1664_p3 = pnand %p1662_p2, %p1659_p1 }
 0x4a1   :  { %1667 = shalt.err (!%p1664_p3)
}
 0x4a2   :  { %1071 = dma.vmem_to_hbm [thread:$0]  %s1066_s17, 1024, %s1940_s4, [#allocation5], %s1675_s25, %s1675_s25, %s1676_s26  }
 0x4a3   :  { %1672 = dma.done.wait [#allocation5], 1024  }
 0x4a4   :  { %1673 = vsyncadd [#allocation5], 4294966272 }
 0x4a5   :  { %1075 = vsyncpa [#allocation4], 1 }
 0x4a6   :  { %1076 = vsyncpa [#allocation7], 1 }
 0x4a7   :  { %1077 = vsyncpa [#allocation5], 1 }

</bundles_post_ra>
